<compile_context>
chip_gen: v5e
topology: v5e:2x2
jax: 0.10.0
libtpu: 0.0.40
codegen_flags: <defaults>
</compile_context>

<pallas_src>
import functools

import jax
import jax.numpy as jnp
from jax import lax
from jax.experimental import pallas as pl
from jax.experimental.pallas import tpu as pltpu


def _gemm_bn_kernel(p_ref, w_ref, scale_ref, shift_ref, o_ref):
    # p_ref:     (TM, Kp)  im2col patch tile (bf16)
    # w_ref:     (Kp, TC)  weight tile (bf16), grid-invariant across inner axis
    # scale_ref: (1, TC)   folded BN scale (f32)
    # shift_ref: (1, TC)   folded BN shift (f32)
    # o_ref:     (TM, TC)  output tile
    acc = jnp.dot(p_ref[...], w_ref[...], preferred_element_type=jnp.float32)
    # Fused BatchNorm (inference) epilogue, kept in f32.
    o_ref[...] = (acc * scale_ref[...] + shift_ref[...]).astype(o_ref.dtype)


def _round_up(x, m):
    return (x + m - 1) // m * m


def _cdiv(a, b):
    return (a + b - 1) // b


@functools.partial(
    jax.jit,
    static_argnames=("stride", "padding", "dilation", "compute_dtype"))
def basic_conv2d(x_nchw, weight_oihw, gamma, beta, running_mean, running_var,
                 *, stride=1, padding=0, dilation=1, eps=1e-5,
                 compute_dtype=jnp.bfloat16):
    """Conv2d(bias=False) + BatchNorm2d (eval mode). x: NCHW, weight: OIHW."""
    N, Cin, H, W = x_nchw.shape
    Cout, _, KH, KW = weight_oihw.shape

    OH = (H + 2 * padding - dilation * (KH - 1) - 1) // stride + 1
    OW = (W + 2 * padding - dilation * (KW - 1) - 1) // stride + 1
    Mt = N * OH * OW                 # collapsed (N, OH*OW) row axis
    K = KH * KW * Cin

    # ---- tiling choices -------------------------------------------------------
    Kp = _round_up(K, 128)                        # lane-dense contraction dim
    Cp = _round_up(Cout, 128)                     # lane-dense output channels
    TC = Cp if Cp <= 512 else 256                 # full MXU output width (v6e/v7x)

    # Balanced row tile: minimize padding, 16-aligned (bf16 sublane packing).
    target_tm = 512
    n_row_tiles = max(1, _cdiv(Mt, target_tm))
    TM = _round_up(_cdiv(Mt, n_row_tiles), 16)
    Mp = _round_up(Mt, TM)

    # ---- wrapper glue (XLA, once): layout + cast + zero pad + im2col ---------
    # Cast to compute dtype BEFORE im2col so the (Mt, Kp) patches intermediate
    # is materialized once, in bf16.
    x_nhwc = jnp.transpose(x_nchw, (0, 2, 3, 1)).astype(compute_dtype)  # NHWC
    x_pad = jnp.pad(x_nhwc, ((0, 0), (padding, padding),
                             (padding, padding), (0, 0)))

    taps = []
    for kh in range(KH):
        for kw in range(KW):
            h0 = kh * dilation
            w0 = kw * dilation
            taps.append(lax.slice(
                x_pad,
                (0, h0, w0, 0),
                (N, h0 + (OH - 1) * stride + 1,
                 w0 + (OW - 1) * stride + 1, Cin),
                (1, stride, stride, 1)))                        # (N,OH,OW,Cin)
    if Kp > K:
        # Fold the K zero-pad into the concatenate (extra zeros tap).
        taps.append(jnp.zeros((N, OH, OW, Kp - K), compute_dtype))
    # (kh, kw, cin) flattened with kh slowest / cin fastest, then collapse rows.
    patches = jnp.concatenate(taps, axis=-1).reshape(Mt, Kp)
    if Mp > Mt:
        patches = jnp.pad(patches, ((0, Mp - Mt), (0, 0)))

    # Weights: OIHW -> (KH, KW, Cin, Cout) -> (K, Cout), same (kh, kw, cin) order.
    w2d = jnp.transpose(weight_oihw, (2, 3, 1, 0)).reshape(K, Cout)
    w2d = jnp.pad(w2d, ((0, Kp - K), (0, Cp - Cout))).astype(compute_dtype)

    # Fold BatchNorm (inference) into per-channel scale/shift.
    scale = gamma * lax.rsqrt(running_var + eps)
    shift = beta - running_mean * scale
    scale_p = jnp.pad(scale, (0, Cp - Cout)).reshape(1, Cp).astype(jnp.float32)
    shift_p = jnp.pad(shift, (0, Cp - Cout)).reshape(1, Cp).astype(jnp.float32)

    # ---- pallas call ----------------------------------------------------------
    # Grid: Cout tiles OUTER, row tiles INNER -> weight/scale/shift block index
    # is constant across the inner axis (no per-step re-DMA); patches stream.
    grid = (Cp // TC, Mp // TM)

    itemsize_c = jnp.dtype(compute_dtype).itemsize
    itemsize_o = jnp.dtype(x_nchw.dtype).itemsize
    cost = pl.CostEstimate(
        flops=2 * Mt * K * Cout,
        transcendentals=0,
        bytes_accessed=(Mp * Kp * itemsize_c            # patches
                        + Kp * Cp * itemsize_c          # weights
                        + Mp * Cp * itemsize_o))        # output

    out = pl.pallas_call(
        _gemm_bn_kernel,
        out_shape=jax.ShapeDtypeStruct((Mp, Cp), x_nchw.dtype),
        grid_spec=pltpu.PrefetchScalarGridSpec(
            num_scalar_prefetch=0,
            grid=grid,
            in_specs=[
                pl.BlockSpec((TM, Kp), lambda c, m: (m, 0)),   # patches (stream)
                pl.BlockSpec((Kp, TC), lambda c, m: (0, c)),   # weights (resident)
                pl.BlockSpec((1, TC), lambda c, m: (0, c)),    # BN scale
                pl.BlockSpec((1, TC), lambda c, m: (0, c)),    # BN shift
            ],
            out_specs=pl.BlockSpec((TM, TC), lambda c, m: (m, c)),
        ),
        compiler_params=pltpu.CompilerParams(
            dimension_semantics=("parallel", "parallel"),
            vmem_limit_bytes=48 << 20),    # above v5e/v6e defaults, under v7x 64 MiB
        cost_estimate=cost,
    )(patches, w2d, scale_p, shift_p)

    # Wrapper glue: drop padding, back to NCHW to match PyTorch.
    out = out[:Mt, :Cout].reshape(N, OH, OW, Cout)
    return jnp.transpose(out, (0, 3, 1, 2))


if __name__ == "__main__":
    # Small shapes consistent with the module: N=2, Cin=4, H=W=16,
    # Cout=8, kernel_size=3, stride=1, padding=1, dilation=1.
    N, Cin, H, W = 2, 4, 16, 16
    Cout, Ksz = 8, 3
    stride, padding, dilation = 1, 1, 1
    eps = 1e-5

    key = jax.random.PRNGKey(0)
    kx, kw_, kg, kb, km, kv = jax.random.split(key, 6)

    x = jax.random.normal(kx, (N, Cin, H, W), jnp.float32)
    weight = jax.random.normal(kw_, (Cout, Cin, Ksz, Ksz), jnp.float32) * 0.1
    gamma = jax.random.normal(kg, (Cout,), jnp.float32) * 0.1 + 1.0
    beta = jax.random.normal(kb, (Cout,), jnp.float32) * 0.1
    running_mean = jax.random.normal(km, (Cout,), jnp.float32) * 0.1
    running_var = jax.random.uniform(kv, (Cout,), jnp.float32,
                                     minval=0.5, maxval=1.5)

    out = basic_conv2d(x, weight, gamma, beta, running_mean, running_var,
                       stride=stride, padding=padding, dilation=dilation, eps=eps)
    out = jax.block_until_ready(out)

    # Reference: XLA conv + BN using the same bf16-rounded operands as the kernel
    # (kernel accumulates in f32), so only accumulation-order noise remains.
    x_bf = x.astype(jnp.bfloat16).astype(jnp.float32)
    w_bf = weight.astype(jnp.bfloat16).astype(jnp.float32)
    ref_conv = lax.conv_general_dilated(
        x_bf, w_bf, window_strides=(stride, stride),
        padding=((padding, padding), (padding, padding)),
        rhs_dilation=(dilation, dilation),
        dimension_numbers=("NCHW", "OIHW", "NCHW"),
        precision=lax.Precision.HIGHEST)
    ref = (ref_conv - running_mean[None, :, None, None]) / jnp.sqrt(
        running_var[None, :, None, None] + eps)
    ref = ref * gamma[None, :, None, None] + beta[None, :, None, None]

    assert out.shape == (N, Cout, H, W), out.shape
    max_err = float(jnp.max(jnp.abs(out - ref)))
    assert jnp.allclose(out, ref, atol=1e-2, rtol=1e-2), max_err
    print("KERNEL_OK")
</pallas_src>

<mosaic_0001>
module attributes {stable_mosaic.version = 11 : i64} {
  func.func @_gemm_bn_kernel(%arg0: i32, %arg1: i32, %arg2: memref<512x128xbf16, #tpu.memory_space<vmem>>, %arg3: memref<128x128xbf16, #tpu.memory_space<vmem>>, %arg4: memref<1x128xf32, #tpu.memory_space<vmem>>, %arg5: memref<1x128xf32, #tpu.memory_space<vmem>>, %arg6: memref<512x128xf32, #tpu.memory_space<vmem>>) attributes {dimension_semantics = [#tpu.dimension_semantics<parallel>, #tpu.dimension_semantics<parallel>], iteration_bounds = array<i64: 1, 1>, scalar_prefetch = 0 : i64, scratch_operands = 0 : i64, tpu.core_type = #tpu.core_type<tc>, window_params = [{transform_indices = @transform_0, window_bounds = array<i64: 512, 128>}, {transform_indices = @transform_1, window_bounds = array<i64: 128, 128>}, {transform_indices = @transform_2, window_bounds = array<i64: 1, 128>}, {transform_indices = @transform_3, window_bounds = array<i64: 1, 128>}, {transform_indices = @transform_4, window_bounds = array<i64: 512, 128>}]} {
    %c0 = arith.constant 0 : index
    %c0_0 = arith.constant 0 : index
    %0 = vector.load %arg2[%c0, %c0_0] : memref<512x128xbf16, #tpu.memory_space<vmem>>, vector<512x128xbf16>
    %c0_1 = arith.constant 0 : index
    %c0_2 = arith.constant 0 : index
    %1 = vector.load %arg3[%c0_1, %c0_2] : memref<128x128xbf16, #tpu.memory_space<vmem>>, vector<128x128xbf16>
    %cst = arith.constant dense<0.000000e+00> : vector<512x128xf32>
    %2 = tpu.matmul %0, %1, %cst {dimension_numbers = #tpu.dot_dimension_numbers<[1], [0], [0], [1], [0, 0, 1, 1], [], []>} : vector<512x128xbf16>, vector<128x128xbf16>, vector<512x128xf32> -> vector<512x128xf32>
    %c0_3 = arith.constant 0 : index
    %c0_4 = arith.constant 0 : index
    %3 = vector.load %arg4[%c0_3, %c0_4] : memref<1x128xf32, #tpu.memory_space<vmem>>, vector<1x128xf32>
    %4 = vector.broadcast %3 : vector<1x128xf32> to vector<512x128xf32>
    %5 = arith.mulf %2, %4 : vector<512x128xf32>
    %c0_5 = arith.constant 0 : index
    %c0_6 = arith.constant 0 : index
    %6 = vector.load %arg5[%c0_5, %c0_6] : memref<1x128xf32, #tpu.memory_space<vmem>>, vector<1x128xf32>
    %7 = vector.broadcast %6 : vector<1x128xf32> to vector<512x128xf32>
    %8 = arith.addf %5, %7 : vector<512x128xf32>
    %c0_7 = arith.constant 0 : index
    %c0_8 = arith.constant 0 : index
    %9 = vector.load %arg6[%c0_7, %c0_8] : memref<512x128xf32, #tpu.memory_space<vmem>>, vector<512x128xf32>
    tpu.vector_store %arg6[%c0_7, %c0_8], %8 {strides = array<i32>} : memref<512x128xf32, #tpu.memory_space<vmem>>, vector<512x128xf32>,
    return
  }
  func.func @transform_0(%arg0: i32, %arg1: i32) -> (i32, i32) {
    %c0_i32 = arith.constant 0 : i32
    %c0_i32_0 = arith.constant 0 : i32
    return %arg1, %c0_i32 : i32, i32
  }
  func.func @transform_1(%arg0: i32, %arg1: i32) -> (i32, i32) {
    %c0_i32 = arith.constant 0 : i32
    %c0_i32_0 = arith.constant 0 : i32
    return %c0_i32, %arg0 : i32, i32
  }
  func.func @transform_2(%arg0: i32, %arg1: i32) -> (i32, i32) {
    %c0_i32 = arith.constant 0 : i32
    %c0_i32_0 = arith.constant 0 : i32
    return %c0_i32, %arg0 : i32, i32
  }
  func.func @transform_3(%arg0: i32, %arg1: i32) -> (i32, i32) {
    %c0_i32 = arith.constant 0 : i32
    %c0_i32_0 = arith.constant 0 : i32
    return %c0_i32, %arg0 : i32, i32
  }
  func.func @transform_4(%arg0: i32, %arg1: i32) -> (i32, i32) {
    %c0_i32 = arith.constant 0 : i32
    return %arg1, %arg0 : i32, i32
  }
}

</mosaic_0001>

<bundles_post_ra>
// kernel: basic_conv2d.1
= control target key start
LH: loop header
LB: loop body
LE: loop exit
PB: predicated region body
PF: predicated region fallthrough
CT: control target
= control target key end

     0   :  { %s1411_s1 = inlined_call_operand.vmem [shape: bf16[128,128], index: 1, kind: input, shape index: {}]   ;;  %s1412_s2 = inlined_call_operand.vmem [shape: f32[1,128], index: 2, kind: input, shape index: {}]   ;;  %s1413_s3 = inlined_call_operand.vmem [shape: f32[1,128], index: 3, kind: input, shape index: {}]   ;;  %s1414_s0 = inlined_call_operand.vmem [shape: bf16[512,128], index: 0, kind: input, shape index: {}]   ;;  %s1415_s4 = inlined_call_operand.vmem [shape: f32[512,128], index: 4, kind: output, shape index: {}]  }
   0x1   :  { %v909_v0 = vld [vmem:[%s1411_s1 + $0x38] sm:$0xff]  ;;  %v908_v1 = vld [vmem:[%s1411_s1 + $0x30] sm:$0xff]  ;;  %v907_v2 = vld [vmem:[%s1411_s1 + $0x28] sm:$0xff] }
   0x2   :  { %337 = vmatpush.bf16.msra.mxu0 %v909_v0  ;;  %910 = vmatpush.bf16.msra.mxu1 %v909_v0  ;;  %v906_v3 = vld [vmem:[%s1411_s1 + $0x20] sm:$0xff]  ;;  %v905_v4 = vld [vmem:[%s1411_s1 + $0x18] sm:$0xff]  ;;  %v904_v5 = vld [vmem:[%s1411_s1 + $0x10] sm:$0xff] }
   0x3   :  { %911 = vmatpush.bf16.msra.mxu2 %v909_v0  ;;  %912 = vmatpush.bf16.msra.mxu3 %v909_v0  ;;  %v903_v6 = vld [vmem:[%s1411_s1 + $0x8] sm:$0xff]  ;;  %v902_v7 = vld [vmem:[%s1411_s1] sm:$0xff]  ;;  %v872_v16 = vld [vmem:[%s1414_s0 + $0x10] sm:$0xff] }
   0x4   :  { %v870_v8 = vld [vmem:[%s1414_s0] sm:$0xff]  ;;  %v871_v12 = vld [vmem:[%s1414_s0 + $0x8] sm:$0xff]  ;;  %v880_v17 = vld [vmem:[%s1414_s0 + $0x50] sm:$0xff] }
   0x5   :  { %v878_v9 = vld [vmem:[%s1414_s0 + $0x40] sm:$0xff]  ;;  %v879_v13 = vld [vmem:[%s1414_s0 + $0x48] sm:$0xff]  ;;  %v888_v18 = vld [vmem:[%s1414_s0 + $0x90] sm:$0xff] }
   0x6   :  { %338 = vmatpush.bf16.msra.mxu0 %v908_v1  ;;  %913 = vmatpush.bf16.msra.mxu1 %v908_v1  ;;  %v886_v10 = vld [vmem:[%s1414_s0 + $0x80] sm:$0xff]  ;;  %v887_v14 = vld [vmem:[%s1414_s0 + $0x88] sm:$0xff]  ;;  %v896_v19 = vld [vmem:[%s1414_s0 + $0xd0] sm:$0xff] }
   0x7   :  { %914 = vmatpush.bf16.msra.mxu2 %v908_v1  ;;  %915 = vmatpush.bf16.msra.mxu3 %v908_v1  ;;  %v894_v11 = vld [vmem:[%s1414_s0 + $0xc0] sm:$0xff]  ;;  %v895_v15 = vld [vmem:[%s1414_s0 + $0xc8] sm:$0xff]  ;;  %v873_v20 = vld [vmem:[%s1414_s0 + $0x18] sm:$0xff] }
   0x8   :  { %v881_v21 = vld [vmem:[%s1414_s0 + $0x58] sm:$0xff]  ;;  %v874_v24 = vld [vmem:[%s1414_s0 + $0x20] sm:$0xff]  ;;  %v875_v28 = vld [vmem:[%s1414_s0 + $0x28] sm:$0xff] }
   0x9   :  { %v889_v22 = vld [vmem:[%s1414_s0 + $0x98] sm:$0xff]  ;;  %v882_v25 = vld [vmem:[%s1414_s0 + $0x60] sm:$0xff]  ;;  %v883_v29 = vld [vmem:[%s1414_s0 + $0x68] sm:$0xff] }
   0xa   :  { %339 = vmatpush.bf16.msra.mxu0 %v907_v2  ;;  %916 = vmatpush.bf16.msra.mxu1 %v907_v2  ;;  %v897_v23 = vld [vmem:[%s1414_s0 + $0xd8] sm:$0xff]  ;;  %v890_v26 = vld [vmem:[%s1414_s0 + $0xa0] sm:$0xff]  ;;  %v891_v30 = vld [vmem:[%s1414_s0 + $0xa8] sm:$0xff] }
   0xb   :  { %917 = vmatpush.bf16.msra.mxu2 %v907_v2  ;;  %918 = vmatpush.bf16.msra.mxu3 %v907_v2  ;;  %v898_v27 = vld [vmem:[%s1414_s0 + $0xe0] sm:$0xff]  ;;  %v899_v31 = vld [vmem:[%s1414_s0 + $0xe8] sm:$0xff]  ;;  %v876_v32 = vld [vmem:[%s1414_s0 + $0x30] sm:$0xff] }
   0xc   :  { %v884_v33 = vld [vmem:[%s1414_s0 + $0x70] sm:$0xff]  ;;  %v877_v36 = vld [vmem:[%s1414_s0 + $0x38] sm:$0xff]  ;;  %v1084_v40 = vld [vmem:[%s1412_s2] ss:$0 sm:$0xff] }
   0xd   :  { %v892_v34 = vld [vmem:[%s1414_s0 + $0xb0] sm:$0xff]  ;;  %v885_v37 = vld [vmem:[%s1414_s0 + $0x78] sm:$0xff]  ;;  %v1089_v41 = vld [vmem:[%s1413_s3] ss:$0 sm:$0xff] }
   0xe   :  { %340 = vmatpush.bf16.msra.mxu0 %v906_v3  ;;  %919 = vmatpush.bf16.msra.mxu1 %v906_v3  ;;  %v900_v35 = vld [vmem:[%s1414_s0 + $0xf0] sm:$0xff]  ;;  %v893_v38 = vld [vmem:[%s1414_s0 + $0xb8] sm:$0xff] }
   0xf   :  { %920 = vmatpush.bf16.msra.mxu2 %v906_v3  ;;  %921 = vmatpush.bf16.msra.mxu3 %v906_v3  ;;  %v901_v39 = vld [vmem:[%s1414_s0 + $0xf8] sm:$0xff] }
  0x12   :  { %341 = vmatpush.bf16.msra.mxu0 %v905_v4  ;;  %922 = vmatpush.bf16.msra.mxu1 %v905_v4 }
  0x13   :  { %923 = vmatpush.bf16.msra.mxu2 %v905_v4  ;;  %924 = vmatpush.bf16.msra.mxu3 %v905_v4 }
  0x16   :  { %342 = vmatpush.bf16.msra.mxu0 %v904_v5  ;;  %925 = vmatpush.bf16.msra.mxu1 %v904_v5 }
  0x17   :  { %926 = vmatpush.bf16.msra.mxu2 %v904_v5  ;;  %927 = vmatpush.bf16.msra.mxu3 %v904_v5 }
  0x1a   :  { %343 = vmatpush.bf16.msra.mxu0 %v903_v6  ;;  %928 = vmatpush.bf16.msra.mxu1 %v903_v6 }
  0x1b   :  { %929 = vmatpush.bf16.msra.mxu2 %v903_v6  ;;  %930 = vmatpush.bf16.msra.mxu3 %v903_v6 }
  0x1e   :  { %344 = vmatpush.bf16.msra.mxu0 %v902_v7  ;;  %931 = vmatpush.bf16.msra.mxu1 %v902_v7 }
  0x1f   :  { %932 = vmatpush.bf16.msra.mxu2 %v902_v7  ;;  %933 = vmatpush.bf16.msra.mxu3 %v902_v7 }
  0x21   :  { %345 = vmatmul.bf16.vlgmr.msra.gmra.mxu0 %v870_v8  ;;  %385 = vmatmul.bf16.vlgmr.msra.gmra.mxu1 %v878_v9 }
  0x22   :  { %425 = vmatmul.bf16.vlgmr.msra.gmra.mxu2 %v886_v10  ;;  %465 = vmatmul.bf16.vlgmr.msra.gmra.mxu3 %v894_v11 }
  0x31   :  { %350 = vmatmul.bf16.gmra.mxu0 %v871_v12  ;;  %390 = vmatmul.bf16.gmra.mxu1 %v879_v13 }
  0x32   :  { %430 = vmatmul.bf16.gmra.mxu2 %v887_v14  ;;  %470 = vmatmul.bf16.gmra.mxu3 %v895_v15 }
  0x41   :  { %355 = vmatmul.bf16.gmra.mxu0 %v872_v16  ;;  %395 = vmatmul.bf16.gmra.mxu1 %v880_v17 }
  0x42   :  { %435 = vmatmul.bf16.gmra.mxu2 %v888_v18  ;;  %475 = vmatmul.bf16.gmra.mxu3 %v896_v19 }
  0x51   :  { %360 = vmatmul.bf16.gmra.mxu0 %v873_v20  ;;  %400 = vmatmul.bf16.gmra.mxu1 %v881_v21 }
  0x52   :  { %440 = vmatmul.bf16.gmra.mxu2 %v889_v22  ;;  %480 = vmatmul.bf16.gmra.mxu3 %v897_v23 }
  0x61   :  { %365 = vmatmul.bf16.gmra.mxu0 %v874_v24  ;;  %405 = vmatmul.bf16.gmra.mxu1 %v882_v25 }
  0x62   :  { %445 = vmatmul.bf16.gmra.mxu2 %v890_v26  ;;  %485 = vmatmul.bf16.gmra.mxu3 %v898_v27 }
  0x71   :  { %370 = vmatmul.bf16.gmra.mxu0 %v875_v28  ;;  %410 = vmatmul.bf16.gmra.mxu1 %v883_v29 }
  0x72   :  { %450 = vmatmul.bf16.gmra.mxu2 %v891_v30  ;;  %490 = vmatmul.bf16.gmra.mxu3 %v899_v31 }
  0x81   :  { %375 = vmatmul.bf16.gmra.mxu0 %v876_v32  ;;  %415 = vmatmul.bf16.gmra.mxu1 %v884_v33 }
  0x82   :  { %455 = vmatmul.bf16.gmra.mxu2 %v892_v34  ;;  %495 = vmatmul.bf16.gmra.mxu3 %v900_v35 }
  0x91   :  { %380 = vmatmul.bf16.gmra.mxu0 %v877_v36  ;;  %420 = vmatmul.bf16.gmra.mxu1 %v885_v37 }
  0x92   :  { %460 = vmatmul.bf16.gmra.mxu2 %v893_v38  ;;  %500 = vmatmul.bf16.gmra.mxu3 %v901_v39 }
  0x9e   :  { %v346_v42 = vpop.f32.mrf.mxu0  ;;  %v386_v43 = vpop.f32.mrf.mxu1 }
  0x9f   :  { %v510_v44 = vmul.f32 %v1084_v40, %v346_v42  ;;  %v526_v45 = vmul.f32 %v1084_v40, %v386_v43 }
  0xa1   :  { %v578_v46 = vadd.f32 %v1089_v41, %v510_v44  ;;  %v594_v47 = vadd.f32 %v1089_v41, %v526_v45 }
  0xa3   :  { %642 = vst [vmem:[%s1415_s4] sm:$0xff] %v578_v46 }
  0xa4   :  { %658 = vst [vmem:[%s1415_s4 + $0x80] sm:$0xff] %v594_v47 }
  0xa5   :  { %v426_v48 = vpop.f32.mrf.mxu2  ;;  %v466_v49 = vpop.f32.mrf.mxu3 }
  0xa6   :  { %v542_v50 = vmul.f32 %v1084_v40, %v426_v48  ;;  %v558_v51 = vmul.f32 %v1084_v40, %v466_v49  ;;  %v348_v52 = vpop.f32.mrf.mxu0  ;;  %v388_v53 = vpop.f32.mrf.mxu1 }
  0xa7   :  { %v511_v54 = vmul.f32 %v1084_v40, %v348_v52  ;;  %v527_v55 = vmul.f32 %v1084_v40, %v388_v53 }
  0xa8   :  { %v610_v56 = vadd.f32 %v1089_v41, %v542_v50  ;;  %v626_v57 = vadd.f32 %v1089_v41, %v558_v51 }
  0xa9   :  { %v579_v58 = vadd.f32 %v1089_v41, %v511_v54  ;;  %v595_v59 = vadd.f32 %v1089_v41, %v527_v55 }
  0xaa   :  { %674 = vst [vmem:[%s1415_s4 + $0x100] sm:$0xff] %v610_v56 }
  0xab   :  { %690 = vst [vmem:[%s1415_s4 + $0x180] sm:$0xff] %v626_v57 }
  0xac   :  { %643 = vst [vmem:[%s1415_s4 + $0x8] sm:$0xff] %v579_v58 }
  0xad   :  { %659 = vst [vmem:[%s1415_s4 + $0x88] sm:$0xff] %v595_v59  ;;  %v428_v60 = vpop.f32.mrf.mxu2  ;;  %v468_v61 = vpop.f32.mrf.mxu3 }
  0xae   :  { %v543_v62 = vmul.f32 %v1084_v40, %v428_v60  ;;  %v559_v63 = vmul.f32 %v1084_v40, %v468_v61  ;;  %v351_v0 = vpop.f32.mrf.mxu0  ;;  %v391_v1 = vpop.f32.mrf.mxu1 }
  0xaf   :  { %v512_v2 = vmul.f32 %v1084_v40, %v351_v0  ;;  %v528_v3 = vmul.f32 %v1084_v40, %v391_v1 }
  0xb0   :  { %v611_v4 = vadd.f32 %v1089_v41, %v543_v62  ;;  %v627_v5 = vadd.f32 %v1089_v41, %v559_v63 }
  0xb1   :  { %v580_v6 = vadd.f32 %v1089_v41, %v512_v2  ;;  %v596_v7 = vadd.f32 %v1089_v41, %v528_v3 }
  0xb2   :  { %675 = vst [vmem:[%s1415_s4 + $0x108] sm:$0xff] %v611_v4 }
  0xb3   :  { %691 = vst [vmem:[%s1415_s4 + $0x188] sm:$0xff] %v627_v5 }
  0xb4   :  { %644 = vst [vmem:[%s1415_s4 + $0x10] sm:$0xff] %v580_v6 }
  0xb5   :  { %660 = vst [vmem:[%s1415_s4 + $0x90] sm:$0xff] %v596_v7  ;;  %v431_v8 = vpop.f32.mrf.mxu2  ;;  %v471_v9 = vpop.f32.mrf.mxu3 }
  0xb6   :  { %v544_v10 = vmul.f32 %v1084_v40, %v431_v8  ;;  %v560_v11 = vmul.f32 %v1084_v40, %v471_v9  ;;  %v353_v12 = vpop.f32.mrf.mxu0  ;;  %v393_v13 = vpop.f32.mrf.mxu1 }
  0xb7   :  { %v513_v14 = vmul.f32 %v1084_v40, %v353_v12  ;;  %v529_v15 = vmul.f32 %v1084_v40, %v393_v13 }
  0xb8   :  { %v612_v16 = vadd.f32 %v1089_v41, %v544_v10  ;;  %v628_v17 = vadd.f32 %v1089_v41, %v560_v11 }
  0xb9   :  { %v581_v18 = vadd.f32 %v1089_v41, %v513_v14  ;;  %v597_v19 = vadd.f32 %v1089_v41, %v529_v15 }
  0xba   :  { %676 = vst [vmem:[%s1415_s4 + $0x110] sm:$0xff] %v612_v16 }
  0xbb   :  { %692 = vst [vmem:[%s1415_s4 + $0x190] sm:$0xff] %v628_v17 }
  0xbc   :  { %645 = vst [vmem:[%s1415_s4 + $0x18] sm:$0xff] %v581_v18 }
  0xbd   :  { %661 = vst [vmem:[%s1415_s4 + $0x98] sm:$0xff] %v597_v19  ;;  %v433_v20 = vpop.f32.mrf.mxu2  ;;  %v473_v21 = vpop.f32.mrf.mxu3 }
  0xbe   :  { %v545_v22 = vmul.f32 %v1084_v40, %v433_v20  ;;  %v561_v23 = vmul.f32 %v1084_v40, %v473_v21  ;;  %v356_v24 = vpop.f32.mrf.mxu0  ;;  %v396_v25 = vpop.f32.mrf.mxu1 }
  0xbf   :  { %v514_v26 = vmul.f32 %v1084_v40, %v356_v24  ;;  %v530_v27 = vmul.f32 %v1084_v40, %v396_v25 }
  0xc0   :  { %v613_v28 = vadd.f32 %v1089_v41, %v545_v22  ;;  %v629_v29 = vadd.f32 %v1089_v41, %v561_v23 }
  0xc1   :  { %v582_v30 = vadd.f32 %v1089_v41, %v514_v26  ;;  %v598_v31 = vadd.f32 %v1089_v41, %v530_v27 }
  0xc2   :  { %677 = vst [vmem:[%s1415_s4 + $0x118] sm:$0xff] %v613_v28 }
  0xc3   :  { %693 = vst [vmem:[%s1415_s4 + $0x198] sm:$0xff] %v629_v29 }
  0xc4   :  { %646 = vst [vmem:[%s1415_s4 + $0x20] sm:$0xff] %v582_v30 }
  0xc5   :  { %662 = vst [vmem:[%s1415_s4 + $0xa0] sm:$0xff] %v598_v31  ;;  %v436_v32 = vpop.f32.mrf.mxu2  ;;  %v476_v33 = vpop.f32.mrf.mxu3 }
  0xc6   :  { %v546_v34 = vmul.f32 %v1084_v40, %v436_v32  ;;  %v562_v35 = vmul.f32 %v1084_v40, %v476_v33  ;;  %v358_v36 = vpop.f32.mrf.mxu0  ;;  %v398_v37 = vpop.f32.mrf.mxu1 }
  0xc7   :  { %v515_v38 = vmul.f32 %v1084_v40, %v358_v36  ;;  %v531_v39 = vmul.f32 %v1084_v40, %v398_v37 }
  0xc8   :  { %v614_v42 = vadd.f32 %v1089_v41, %v546_v34  ;;  %v630_v43 = vadd.f32 %v1089_v41, %v562_v35 }
  0xc9   :  { %v583_v44 = vadd.f32 %v1089_v41, %v515_v38  ;;  %v599_v45 = vadd.f32 %v1089_v41, %v531_v39 }
  0xca   :  { %678 = vst [vmem:[%s1415_s4 + $0x120] sm:$0xff] %v614_v42 }
  0xcb   :  { %694 = vst [vmem:[%s1415_s4 + $0x1a0] sm:$0xff] %v630_v43 }
  0xcc   :  { %647 = vst [vmem:[%s1415_s4 + $0x28] sm:$0xff] %v583_v44 }
  0xcd   :  { %663 = vst [vmem:[%s1415_s4 + $0xa8] sm:$0xff] %v599_v45  ;;  %v438_v46 = vpop.f32.mrf.mxu2  ;;  %v478_v47 = vpop.f32.mrf.mxu3 }
  0xce   :  { %v547_v48 = vmul.f32 %v1084_v40, %v438_v46  ;;  %v563_v49 = vmul.f32 %v1084_v40, %v478_v47  ;;  %v361_v50 = vpop.f32.mrf.mxu0  ;;  %v401_v51 = vpop.f32.mrf.mxu1 }
  0xcf   :  { %v516_v52 = vmul.f32 %v1084_v40, %v361_v50  ;;  %v532_v53 = vmul.f32 %v1084_v40, %v401_v51 }
  0xd0   :  { %v615_v54 = vadd.f32 %v1089_v41, %v547_v48  ;;  %v631_v55 = vadd.f32 %v1089_v41, %v563_v49 }
  0xd1   :  { %v584_v56 = vadd.f32 %v1089_v41, %v516_v52  ;;  %v600_v57 = vadd.f32 %v1089_v41, %v532_v53 }
  0xd2   :  { %679 = vst [vmem:[%s1415_s4 + $0x128] sm:$0xff] %v615_v54 }
  0xd3   :  { %695 = vst [vmem:[%s1415_s4 + $0x1a8] sm:$0xff] %v631_v55 }
  0xd4   :  { %648 = vst [vmem:[%s1415_s4 + $0x30] sm:$0xff] %v584_v56 }
  0xd5   :  { %664 = vst [vmem:[%s1415_s4 + $0xb0] sm:$0xff] %v600_v57  ;;  %v441_v58 = vpop.f32.mrf.mxu2  ;;  %v481_v59 = vpop.f32.mrf.mxu3 }
  0xd6   :  { %v548_v60 = vmul.f32 %v1084_v40, %v441_v58  ;;  %v564_v61 = vmul.f32 %v1084_v40, %v481_v59  ;;  %v363_v62 = vpop.f32.mrf.mxu0  ;;  %v403_v63 = vpop.f32.mrf.mxu1 }
  0xd7   :  { %v517_v0 = vmul.f32 %v1084_v40, %v363_v62  ;;  %v533_v1 = vmul.f32 %v1084_v40, %v403_v63 }
  0xd8   :  { %v616_v2 = vadd.f32 %v1089_v41, %v548_v60  ;;  %v632_v3 = vadd.f32 %v1089_v41, %v564_v61 }
  0xd9   :  { %v585_v4 = vadd.f32 %v1089_v41, %v517_v0  ;;  %v601_v5 = vadd.f32 %v1089_v41, %v533_v1 }
  0xda   :  { %680 = vst [vmem:[%s1415_s4 + $0x130] sm:$0xff] %v616_v2 }
  0xdb   :  { %696 = vst [vmem:[%s1415_s4 + $0x1b0] sm:$0xff] %v632_v3 }
  0xdc   :  { %649 = vst [vmem:[%s1415_s4 + $0x38] sm:$0xff] %v585_v4 }
  0xdd   :  { %665 = vst [vmem:[%s1415_s4 + $0xb8] sm:$0xff] %v601_v5  ;;  %v443_v6 = vpop.f32.mrf.mxu2  ;;  %v483_v7 = vpop.f32.mrf.mxu3 }
  0xde   :  { %v549_v8 = vmul.f32 %v1084_v40, %v443_v6  ;;  %v565_v9 = vmul.f32 %v1084_v40, %v483_v7  ;;  %v366_v10 = vpop.f32.mrf.mxu0  ;;  %v406_v11 = vpop.f32.mrf.mxu1 }
  0xdf   :  { %v518_v12 = vmul.f32 %v1084_v40, %v366_v10  ;;  %v534_v13 = vmul.f32 %v1084_v40, %v406_v11 }
  0xe0   :  { %v617_v14 = vadd.f32 %v1089_v41, %v549_v8  ;;  %v633_v15 = vadd.f32 %v1089_v41, %v565_v9 }
  0xe1   :  { %v586_v16 = vadd.f32 %v1089_v41, %v518_v12  ;;  %v602_v17 = vadd.f32 %v1089_v41, %v534_v13 }
  0xe2   :  { %681 = vst [vmem:[%s1415_s4 + $0x138] sm:$0xff] %v617_v14 }
  0xe3   :  { %697 = vst [vmem:[%s1415_s4 + $0x1b8] sm:$0xff] %v633_v15 }
  0xe4   :  { %650 = vst [vmem:[%s1415_s4 + $0x40] sm:$0xff] %v586_v16 }
  0xe5   :  { %666 = vst [vmem:[%s1415_s4 + $0xc0] sm:$0xff] %v602_v17  ;;  %v446_v18 = vpop.f32.mrf.mxu2  ;;  %v486_v19 = vpop.f32.mrf.mxu3 }
  0xe6   :  { %v550_v20 = vmul.f32 %v1084_v40, %v446_v18  ;;  %v566_v21 = vmul.f32 %v1084_v40, %v486_v19  ;;  %v368_v22 = vpop.f32.mrf.mxu0  ;;  %v408_v23 = vpop.f32.mrf.mxu1 }
  0xe7   :  { %v519_v24 = vmul.f32 %v1084_v40, %v368_v22  ;;  %v535_v25 = vmul.f32 %v1084_v40, %v408_v23 }
  0xe8   :  { %v618_v26 = vadd.f32 %v1089_v41, %v550_v20  ;;  %v634_v27 = vadd.f32 %v1089_v41, %v566_v21 }
  0xe9   :  { %v587_v28 = vadd.f32 %v1089_v41, %v519_v24  ;;  %v603_v29 = vadd.f32 %v1089_v41, %v535_v25 }
  0xea   :  { %682 = vst [vmem:[%s1415_s4 + $0x140] sm:$0xff] %v618_v26 }
  0xeb   :  { %698 = vst [vmem:[%s1415_s4 + $0x1c0] sm:$0xff] %v634_v27 }
  0xec   :  { %651 = vst [vmem:[%s1415_s4 + $0x48] sm:$0xff] %v587_v28 }
  0xed   :  { %667 = vst [vmem:[%s1415_s4 + $0xc8] sm:$0xff] %v603_v29  ;;  %v448_v30 = vpop.f32.mrf.mxu2  ;;  %v488_v31 = vpop.f32.mrf.mxu3 }
  0xee   :  { %v551_v32 = vmul.f32 %v1084_v40, %v448_v30  ;;  %v567_v33 = vmul.f32 %v1084_v40, %v488_v31  ;;  %v371_v34 = vpop.f32.mrf.mxu0  ;;  %v411_v35 = vpop.f32.mrf.mxu1 }
  0xef   :  { %v520_v36 = vmul.f32 %v1084_v40, %v371_v34  ;;  %v536_v37 = vmul.f32 %v1084_v40, %v411_v35 }
  0xf0   :  { %v619_v38 = vadd.f32 %v1089_v41, %v551_v32  ;;  %v635_v39 = vadd.f32 %v1089_v41, %v567_v33 }
  0xf1   :  { %v588_v42 = vadd.f32 %v1089_v41, %v520_v36  ;;  %v604_v43 = vadd.f32 %v1089_v41, %v536_v37 }
  0xf2   :  { %683 = vst [vmem:[%s1415_s4 + $0x148] sm:$0xff] %v619_v38 }
  0xf3   :  { %699 = vst [vmem:[%s1415_s4 + $0x1c8] sm:$0xff] %v635_v39 }
  0xf4   :  { %652 = vst [vmem:[%s1415_s4 + $0x50] sm:$0xff] %v588_v42 }
  0xf5   :  { %668 = vst [vmem:[%s1415_s4 + $0xd0] sm:$0xff] %v604_v43  ;;  %v451_v44 = vpop.f32.mrf.mxu2  ;;  %v491_v45 = vpop.f32.mrf.mxu3 }
  0xf6   :  { %v552_v46 = vmul.f32 %v1084_v40, %v451_v44  ;;  %v568_v47 = vmul.f32 %v1084_v40, %v491_v45  ;;  %v373_v48 = vpop.f32.mrf.mxu0  ;;  %v413_v49 = vpop.f32.mrf.mxu1 }
  0xf7   :  { %v521_v50 = vmul.f32 %v1084_v40, %v373_v48  ;;  %v537_v51 = vmul.f32 %v1084_v40, %v413_v49 }
  0xf8   :  { %v620_v52 = vadd.f32 %v1089_v41, %v552_v46  ;;  %v636_v53 = vadd.f32 %v1089_v41, %v568_v47 }
  0xf9   :  { %v589_v54 = vadd.f32 %v1089_v41, %v521_v50  ;;  %v605_v55 = vadd.f32 %v1089_v41, %v537_v51 }
  0xfa   :  { %684 = vst [vmem:[%s1415_s4 + $0x150] sm:$0xff] %v620_v52 }
  0xfb   :  { %700 = vst [vmem:[%s1415_s4 + $0x1d0] sm:$0xff] %v636_v53 }
  0xfc   :  { %653 = vst [vmem:[%s1415_s4 + $0x58] sm:$0xff] %v589_v54 }
  0xfd   :  { %669 = vst [vmem:[%s1415_s4 + $0xd8] sm:$0xff] %v605_v55  ;;  %v453_v56 = vpop.f32.mrf.mxu2  ;;  %v493_v57 = vpop.f32.mrf.mxu3 }
  0xfe   :  { %v553_v58 = vmul.f32 %v1084_v40, %v453_v56  ;;  %v569_v59 = vmul.f32 %v1084_v40, %v493_v57  ;;  %v376_v60 = vpop.f32.mrf.mxu0  ;;  %v416_v61 = vpop.f32.mrf.mxu1 }
  0xff   :  { %v522_v62 = vmul.f32 %v1084_v40, %v376_v60  ;;  %v538_v63 = vmul.f32 %v1084_v40, %v416_v61 }
 0x100   :  { %v621_v0 = vadd.f32 %v1089_v41, %v553_v58  ;;  %v637_v1 = vadd.f32 %v1089_v41, %v569_v59 }
 0x101   :  { %v590_v2 = vadd.f32 %v1089_v41, %v522_v62  ;;  %v606_v3 = vadd.f32 %v1089_v41, %v538_v63 }
 0x102   :  { %685 = vst [vmem:[%s1415_s4 + $0x158] sm:$0xff] %v621_v0 }
 0x103   :  { %701 = vst [vmem:[%s1415_s4 + $0x1d8] sm:$0xff] %v637_v1 }
 0x104   :  { %654 = vst [vmem:[%s1415_s4 + $0x60] sm:$0xff] %v590_v2 }
 0x105   :  { %670 = vst [vmem:[%s1415_s4 + $0xe0] sm:$0xff] %v606_v3  ;;  %v456_v4 = vpop.f32.mrf.mxu2  ;;  %v496_v5 = vpop.f32.mrf.mxu3 }
 0x106   :  { %v554_v6 = vmul.f32 %v1084_v40, %v456_v4  ;;  %v570_v7 = vmul.f32 %v1084_v40, %v496_v5  ;;  %v378_v8 = vpop.f32.mrf.mxu0  ;;  %v418_v9 = vpop.f32.mrf.mxu1 }
 0x107   :  { %v523_v10 = vmul.f32 %v1084_v40, %v378_v8  ;;  %v539_v11 = vmul.f32 %v1084_v40, %v418_v9 }
 0x108   :  { %v622_v12 = vadd.f32 %v1089_v41, %v554_v6  ;;  %v638_v13 = vadd.f32 %v1089_v41, %v570_v7 }
 0x109   :  { %v591_v14 = vadd.f32 %v1089_v41, %v523_v10  ;;  %v607_v15 = vadd.f32 %v1089_v41, %v539_v11 }
 0x10a   :  { %686 = vst [vmem:[%s1415_s4 + $0x160] sm:$0xff] %v622_v12 }
 0x10b   :  { %702 = vst [vmem:[%s1415_s4 + $0x1e0] sm:$0xff] %v638_v13 }
 0x10c   :  { %655 = vst [vmem:[%s1415_s4 + $0x68] sm:$0xff] %v591_v14 }
 0x10d   :  { %671 = vst [vmem:[%s1415_s4 + $0xe8] sm:$0xff] %v607_v15  ;;  %v458_v16 = vpop.f32.mrf.mxu2  ;;  %v498_v17 = vpop.f32.mrf.mxu3 }
 0x10e   :  { %v555_v18 = vmul.f32 %v1084_v40, %v458_v16  ;;  %v571_v19 = vmul.f32 %v1084_v40, %v498_v17  ;;  %v381_v20 = vpop.f32.mrf.mxu0  ;;  %v421_v21 = vpop.f32.mrf.mxu1 }
 0x10f   :  { %v524_v22 = vmul.f32 %v1084_v40, %v381_v20  ;;  %v540_v23 = vmul.f32 %v1084_v40, %v421_v21 }
 0x110   :  { %v623_v24 = vadd.f32 %v1089_v41, %v555_v18  ;;  %v639_v25 = vadd.f32 %v1089_v41, %v571_v19 }
 0x111   :  { %v592_v26 = vadd.f32 %v1089_v41, %v524_v22  ;;  %v608_v27 = vadd.f32 %v1089_v41, %v540_v23 }
 0x112   :  { %687 = vst [vmem:[%s1415_s4 + $0x168] sm:$0xff] %v623_v24 }
 0x113   :  { %703 = vst [vmem:[%s1415_s4 + $0x1e8] sm:$0xff] %v639_v25 }
 0x114   :  { %656 = vst [vmem:[%s1415_s4 + $0x70] sm:$0xff] %v592_v26 }
 0x115   :  { %672 = vst [vmem:[%s1415_s4 + $0xf0] sm:$0xff] %v608_v27  ;;  %v461_v28 = vpop.f32.mrf.mxu2  ;;  %v501_v29 = vpop.f32.mrf.mxu3 }
 0x116   :  { %v556_v30 = vmul.f32 %v1084_v40, %v461_v28  ;;  %v572_v31 = vmul.f32 %v1084_v40, %v501_v29  ;;  %v383_v32 = vpop.f32.mrf.mxu0  ;;  %v423_v33 = vpop.f32.mrf.mxu1 }
 0x117   :  { %v525_v34 = vmul.f32 %v1084_v40, %v383_v32  ;;  %v541_v35 = vmul.f32 %v1084_v40, %v423_v33 }
 0x118   :  { %v624_v36 = vadd.f32 %v1089_v41, %v556_v30  ;;  %v640_v37 = vadd.f32 %v1089_v41, %v572_v31 }
 0x119   :  { %v593_v38 = vadd.f32 %v1089_v41, %v525_v34  ;;  %v609_v39 = vadd.f32 %v1089_v41, %v541_v35 }
 0x11a   :  { %688 = vst [vmem:[%s1415_s4 + $0x170] sm:$0xff] %v624_v36 }
 0x11b   :  { %704 = vst [vmem:[%s1415_s4 + $0x1f0] sm:$0xff] %v640_v37 }
 0x11c   :  { %657 = vst [vmem:[%s1415_s4 + $0x78] sm:$0xff] %v593_v38 }
 0x11d   :  { %673 = vst [vmem:[%s1415_s4 + $0xf8] sm:$0xff] %v609_v39  ;;  %v463_v42 = vpop.f32.mrf.mxu2  ;;  %v503_v43 = vpop.f32.mrf.mxu3 }
 0x11e   :  { %v557_v44 = vmul.f32 %v1084_v40, %v463_v42  ;;  %v573_v45 = vmul.f32 %v1084_v40, %v503_v43 }
 0x120   :  { %v625_v46 = vadd.f32 %v1089_v41, %v557_v44  ;;  %v641_v47 = vadd.f32 %v1089_v41, %v573_v45 }
 0x122   :  { %689 = vst [vmem:[%s1415_s4 + $0x178] sm:$0xff] %v625_v46 }
 0x123   :  { %705 = vst [vmem:[%s1415_s4 + $0x1f8] sm:$0xff] %v641_v47 }

</bundles_post_ra>
